<compile_context>
chip_gen: v5e
topology: v5e:2x2
jax: 0.10.0
libtpu: 0.0.40
codegen_flags: <defaults>
</compile_context>

<pallas_src>
import jax
import jax.numpy as jnp
from jax.experimental import pallas as pl
from jax.experimental.pallas import tpu as pltpu


def velocity_block_kernel(x_ref, w1_ref, b1_ref, w2_ref, b2_ref, o_ref):
    # Natural [batch, feature] layout; one fused fc1 -> relu -> fc2 per batch tile.
    # h = relu(x @ W1 + b1), f32 accumulation on the MXU.
    h = jnp.dot(x_ref[...], w1_ref[...], preferred_element_type=jnp.float32)
    h = jnp.maximum(h + b1_ref[...], 0.0)
    # y = h @ W2 + b2; bias added on the f32 accumulator, single downcast on store.
    y = jnp.dot(h, w2_ref[...], preferred_element_type=jnp.float32)
    o_ref[...] = (y + b2_ref[...]).astype(o_ref.dtype)


def _round_up(x, m):
    return ((x + m - 1) // m) * m


def _vmem_budget_bytes():
    # Generation-aware VMEM budget: v5e/v6e have 128 MiB physical VMEM (raise the
    # default scope), v7x has 64 MiB per TensorCore, so stay well under that.
    try:
        kind = jax.devices()[0].device_kind.lower()
    except Exception:  # pragma: no cover - defensive only
        kind = ""
    if ("v5" in kind) or ("v6" in kind):
        return 96 << 20
    return 40 << 20


def velocity_block(x, w1, b1, w2, b2, *, tile_b=None):
    """Fused VelocityBlock forward.

    x : [B, dim]       activations (natural layout, no wrapper copies)
    w1: [dim, hidden]  fc1 weight stored as PyTorch weight.T
    b1: [hidden]
    w2: [hidden, dim]  fc2 weight stored as PyTorch weight.T
    b2: [dim]
    """
    B, dim = x.shape
    hidden = w1.shape[1]
    itemsize = jnp.dtype(x.dtype).itemsize

    budget = _vmem_budget_bytes()

    # Exact per-step footprint: double-buffer the pipelined x/y tiles; weights
    # and biases have constant index maps (DMAed once) but count two buffers to
    # stay conservative; the intermediate h is held in f32.
    fixed_bytes = 2 * (dim * hidden * 2 + hidden + dim) * itemsize
    per_row_bytes = (2 * dim * itemsize      # x tile (double-buffered)
                     + 2 * dim * itemsize    # y tile (double-buffered)
                     + hidden * 4)           # f32 intermediate h

    if tile_b is None:
        avail = max(budget - fixed_bytes - (4 << 20), 1 << 20)  # scheduler headroom
        tile_b = max(8, (avail // per_row_bytes) // 8 * 8)
        tile_b = min(tile_b, 4096)          # past this the kernel is purely HBM-bound
        if B >= 256:
            # Guarantee >= 2 grid steps so the parallel batch axis can shard
            # across both TensorCores on v7x (and pipeline DMA with compute).
            tile_b = min(tile_b, _round_up(pl.cdiv(B, 2), 8))
        tile_b = min(tile_b, _round_up(B, 8))  # never bigger than the batch
    tile_b = max(8, int(tile_b))
    n_tiles = pl.cdiv(B, tile_b)

    flops = 2 * B * dim * hidden * 2
    bytes_accessed = (2 * B * dim + 2 * dim * hidden + hidden + dim) * itemsize
    cost = pl.CostEstimate(flops=flops, transcendentals=0,
                           bytes_accessed=bytes_accessed)

    return pl.pallas_call(
        velocity_block_kernel,
        out_shape=jax.ShapeDtypeStruct((B, dim), x.dtype),
        grid=(n_tiles,),
        in_specs=[
            pl.BlockSpec((tile_b, dim), lambda i: (i, 0)),    # x tile (batch-tiled)
            pl.BlockSpec((dim, hidden), lambda i: (0, 0)),    # W1 (resident)
            pl.BlockSpec((1, hidden), lambda i: (0, 0)),      # b1 row (sublane bcast)
            pl.BlockSpec((hidden, dim), lambda i: (0, 0)),    # W2 (resident)
            pl.BlockSpec((1, dim), lambda i: (0, 0)),         # b2 row
        ],
        out_specs=pl.BlockSpec((tile_b, dim), lambda i: (i, 0)),
        compiler_params=pltpu.CompilerParams(
            dimension_semantics=("parallel",),
            vmem_limit_bytes=int(budget)),
        cost_estimate=cost,
    )(x, w1, b1.reshape(1, hidden), w2, b2.reshape(1, dim))


def reference(x, w1, b1, w2, b2):
    h = jnp.maximum(x @ w1 + b1, 0.0)
    return h @ w2 + b2


if __name__ == "__main__":
    # Shapes implied by the module: xt is [batch, dim]; hidden_dim for fc1 output.
    batch, dim, hidden_dim = 8, 32, 64

    key = jax.random.PRNGKey(0)
    kx, kw1, kb1, kw2, kb2 = jax.random.split(key, 5)

    x = jax.random.normal(kx, (batch, dim), dtype=jnp.float32)

    # Deterministic init mimicking nn.Linear's uniform(-1/sqrt(fan_in), 1/sqrt(fan_in)).
    bound1 = 1.0 / jnp.sqrt(jnp.float32(dim))
    bound2 = 1.0 / jnp.sqrt(jnp.float32(hidden_dim))
    # Stored as [in, out] = PyTorch weight transposed.
    w1 = jax.random.uniform(kw1, (dim, hidden_dim), jnp.float32, -bound1, bound1)
    b1 = jax.random.uniform(kb1, (hidden_dim,), jnp.float32, -bound1, bound1)
    w2 = jax.random.uniform(kw2, (hidden_dim, dim), jnp.float32, -bound2, bound2)
    b2 = jax.random.uniform(kb2, (dim,), jnp.float32, -bound2, bound2)

    out = jax.block_until_ready(velocity_block(x, w1, b1, w2, b2))
    ref = reference(x, w1, b1, w2, b2)
    assert out.shape == (batch, dim)
    assert jnp.allclose(out, ref, atol=1e-5, rtol=1e-5), "mismatch vs reference (small batch)"

    # Second check: batch not a multiple of the tile -> exercises the partial
    # last block and a multi-step (pipelined / megacore-shardable) grid.
    x2 = jax.random.normal(jax.random.PRNGKey(1), (200, dim), dtype=jnp.float32)
    out2 = jax.block_until_ready(velocity_block(x2, w1, b1, w2, b2, tile_b=64))
    ref2 = reference(x2, w1, b1, w2, b2)
    assert out2.shape == (200, dim)
    assert jnp.allclose(out2, ref2, atol=1e-5, rtol=1e-5), "mismatch vs reference (tiled batch)"

    print("KERNEL_OK")
</pallas_src>

<mosaic_0001>
module attributes {stable_mosaic.version = 11 : i64} {
  func.func @velocity_block_kernel(%arg0: i32, %arg1: memref<8x32xf32, #tpu.memory_space<vmem>>, %arg2: memref<32x64xf32, #tpu.memory_space<vmem>>, %arg3: memref<1x64xf32, #tpu.memory_space<vmem>>, %arg4: memref<64x32xf32, #tpu.memory_space<vmem>>, %arg5: memref<1x32xf32, #tpu.memory_space<vmem>>, %arg6: memref<8x32xf32, #tpu.memory_space<vmem>>) attributes {dimension_semantics = [#tpu.dimension_semantics<parallel>], iteration_bounds = array<i64: 1>, scalar_prefetch = 0 : i64, scratch_operands = 0 : i64, tpu.core_type = #tpu.core_type<tc>, window_params = [{transform_indices = @transform_0, window_bounds = array<i64: 8, 32>}, {pipeline_mode = #tpu.pipeline_mode<synchronous>, transform_indices = @transform_1, window_bounds = array<i64: 32, 64>}, {pipeline_mode = #tpu.pipeline_mode<synchronous>, transform_indices = @transform_2, window_bounds = array<i64: 1, 64>}, {pipeline_mode = #tpu.pipeline_mode<synchronous>, transform_indices = @transform_3, window_bounds = array<i64: 64, 32>}, {pipeline_mode = #tpu.pipeline_mode<synchronous>, transform_indices = @transform_4, window_bounds = array<i64: 1, 32>}, {transform_indices = @transform_5, window_bounds = array<i64: 8, 32>}]} {
    %c0 = arith.constant 0 : index
    %c0_0 = arith.constant 0 : index
    %0 = vector.load %arg1[%c0, %c0_0] : memref<8x32xf32, #tpu.memory_space<vmem>>, vector<8x32xf32>
    %c0_1 = arith.constant 0 : index
    %c0_2 = arith.constant 0 : index
    %1 = vector.load %arg2[%c0_1, %c0_2] : memref<32x64xf32, #tpu.memory_space<vmem>>, vector<32x64xf32>
    %cst = arith.constant dense<0.000000e+00> : vector<8x64xf32>
    %2 = tpu.matmul %0, %1, %cst {dimension_numbers = #tpu.dot_dimension_numbers<[1], [0], [0], [1], [0, 0, 1, 1], [], []>} : vector<8x32xf32>, vector<32x64xf32>, vector<8x64xf32> -> vector<8x64xf32>
    %c0_3 = arith.constant 0 : index
    %c0_4 = arith.constant 0 : index
    %3 = vector.load %arg3[%c0_3, %c0_4] : memref<1x64xf32, #tpu.memory_space<vmem>>, vector<1x64xf32>
    %4 = vector.broadcast %3 : vector<1x64xf32> to vector<8x64xf32>
    %5 = arith.addf %2, %4 : vector<8x64xf32>
    %cst_5 = arith.constant 0.000000e+00 : f32
    %6 = vector.broadcast %cst_5 : f32 to vector<8x64xf32>
    %7 = arith.maximumf %5, %6 : vector<8x64xf32>
    %c0_6 = arith.constant 0 : index
    %c0_7 = arith.constant 0 : index
    %8 = vector.load %arg4[%c0_6, %c0_7] : memref<64x32xf32, #tpu.memory_space<vmem>>, vector<64x32xf32>
    %cst_8 = arith.constant dense<0.000000e+00> : vector<8x32xf32>
    %9 = tpu.matmul %7, %8, %cst_8 {dimension_numbers = #tpu.dot_dimension_numbers<[1], [0], [0], [1], [0, 0, 1, 1], [], []>} : vector<8x64xf32>, vector<64x32xf32>, vector<8x32xf32> -> vector<8x32xf32>
    %c0_9 = arith.constant 0 : index
    %c0_10 = arith.constant 0 : index
    %10 = vector.load %arg5[%c0_9, %c0_10] : memref<1x32xf32, #tpu.memory_space<vmem>>, vector<1x32xf32>
    %11 = vector.broadcast %10 : vector<1x32xf32> to vector<8x32xf32>
    %12 = arith.addf %9, %11 : vector<8x32xf32>
    %c0_11 = arith.constant 0 : index
    %c0_12 = arith.constant 0 : index
    %13 = vector.load %arg6[%c0_11, %c0_12] : memref<8x32xf32, #tpu.memory_space<vmem>>, vector<8x32xf32>
    tpu.vector_store %arg6[%c0_11, %c0_12], %12 {strides = array<i32>} : memref<8x32xf32, #tpu.memory_space<vmem>>, vector<8x32xf32>,
    return
  }
  func.func @transform_0(%arg0: i32) -> (i32, i32) {
    %c0_i32 = arith.constant 0 : i32
    %c0_i32_0 = arith.constant 0 : i32
    return %arg0, %c0_i32 : i32, i32
  }
  func.func @transform_1(%arg0: i32) -> (i32, i32) {
    %c0_i32 = arith.constant 0 : i32
    %c0_i32_0 = arith.constant 0 : i32
    %c0_i32_1 = arith.constant 0 : i32
    return %c0_i32, %c0_i32_0 : i32, i32
  }
  func.func @transform_2(%arg0: i32) -> (i32, i32) {
    %c0_i32 = arith.constant 0 : i32
    %c0_i32_0 = arith.constant 0 : i32
    %c0_i32_1 = arith.constant 0 : i32
    return %c0_i32, %c0_i32_0 : i32, i32
  }
  func.func @transform_3(%arg0: i32) -> (i32, i32) {
    %c0_i32 = arith.constant 0 : i32
    %c0_i32_0 = arith.constant 0 : i32
    %c0_i32_1 = arith.constant 0 : i32
    return %c0_i32, %c0_i32_0 : i32, i32
  }
  func.func @transform_4(%arg0: i32) -> (i32, i32) {
    %c0_i32 = arith.constant 0 : i32
    %c0_i32_0 = arith.constant 0 : i32
    %c0_i32_1 = arith.constant 0 : i32
    return %c0_i32, %c0_i32_0 : i32, i32
  }
  func.func @transform_5(%arg0: i32) -> (i32, i32) {
    %c0_i32 = arith.constant 0 : i32
    %c0_i32_0 = arith.constant 0 : i32
    return %arg0, %c0_i32 : i32, i32
  }
}

</mosaic_0001>

<bundles_post_ra>
// kernel: tpu_custom_call.1
= control target key start
LH: loop header
LB: loop body
LE: loop exit
PB: predicated region body
PF: predicated region fallthrough
CT: control target
= control target key end

     0   :  { %s220_s0 = inlined_call_operand.vmem [shape: f32[8,32], index: 0, kind: input, shape index: {}]   ;;  %s221_s1 = inlined_call_operand.vmem [shape: f32[32,64], index: 1, kind: input, shape index: {}]   ;;  %s222_s2 = inlined_call_operand.vmem [shape: f32[1,64], index: 2, kind: input, shape index: {}]   ;;  %s223_s3 = inlined_call_operand.vmem [shape: f32[64,32], index: 3, kind: input, shape index: {}]   ;;  %s224_s4 = inlined_call_operand.vmem [shape: f32[1,32], index: 4, kind: input, shape index: {}]   ;;  %s225_s5 = inlined_call_operand.hbm [shape: f32[8,32], index: 5, kind: output, shape index: {}]  }
   0x1   :  { %v25_v0 = vld [vmem:[%s221_s1 + $0x18] sm:$0xff]  ;;  %v24_v1 = vld [vmem:[%s221_s1 + $0x10] sm:$0xff]  ;;  %v23_v3 = vld [vmem:[%s221_s1 + $0x8] sm:$0xff] }
   0x2   :  { %46 = vmatpush.msra.mxu0 %v25_v0  ;;  %v62_v2 = vld [vmem:[%s223_s3 + $0x38] sm:$0xff]  ;;  %v61_v4 = vld [vmem:[%s223_s3 + $0x30] sm:$0xff]  ;;  %v60_v5 = vld [vmem:[%s223_s3 + $0x28] sm:$0xff] }
   0x3   :  { %79 = vmatpush.msra.mxu1 %v62_v2  ;;  %v22_v6 = vld [vmem:[%s221_s1] sm:$0xff] }
   0x4   :  { %47 = vmatpush.msra.mxu0 %v24_v1 }
   0x5   :  { %80 = vmatpush.msra.mxu1 %v61_v4 }
   0x6   :  { %10 = vsyncpa [#allocation3], 0  ;;  %48 = vmatpush.msra.mxu0 %v23_v3  ;;  %v21_v7 = vld [vmem:[%s220_s0] sm:$0xff]  ;;  %vm30_vm0 = vcmask 261120   ;;  %v58_v9 = vld [vmem:[%s223_s3 + $0x18] sm:$0xff]  ;;  %vm67_vm1 = vcmask 523264  }
   0x7   :  { %v59_v8 = vld [vmem:[%s223_s3 + $0x20] sm:$0xff]  ;;  %81 = vmatpush.msra.mxu1 %v60_v5  ;;  %v57_v10 = vld [vmem:[%s223_s3 + $0x10] sm:$0xff]  ;;  %v56_v11 = vld [vmem:[%s223_s3 + $0x8] sm:$0xff]  ;;  %s139_s21 = smov [#allocation2]  }
   0x8   :  { %49 = vmatpush.msra.mxu0 %v22_v6  ;;  %v55_v12 = vld [vmem:[%s223_s3] sm:$0xff]  ;;  %s97_s22 = sshll.u32 %s139_s21, 4  ;;  %s99_s3 = sshll.u32 %s225_s5, 4  ;;  %s98_s22 = int_to_ptr.vmem [resolvable:$true] %s97_s22  ;;  %s100_s3 = int_to_ptr.hbm [resolvable:$true] %s99_s3 }
   0x9   :  { %108 = vmatmul.msk.f32.vlgmr.msra.gmra.mxu0 %vm30_vm0, %v21_v7  ;;  %82 = vmatpush.msra.mxu1 %v59_v8  ;;  %v111_v13 = vld [vmem:[%s222_s2] ss:$0 sm:$0xff] }
   0xa   :  { %v112_v17 = vld [vmem:[%s224_s4] ss:$0 sm:$0xff] }
   0xb   :  { %83 = vmatpush.msra.mxu1 %v58_v9 }
   0xd   :  { %84 = vmatpush.msra.mxu1 %v57_v10 }
   0xf   :  { %85 = vmatpush.msra.mxu1 %v56_v11 }
  0x11   :  { %86 = vmatpush.msra.mxu1 %v55_v12 }
  0x86   :  { %v51_v14 = vpop.f32.mrf.mxu0 }
  0x87   :  { %v52_v15 = vadd.f32 %v111_v13, %v51_v14 }
  0x89   :  { %v54_v16 = vmax.f32 %v52_v15, 0.0 }
  0x8b   :  { %109 = vmatmul.msk.f32.vlgmr.msra.gmra.mxu1 %vm67_vm1, %v54_v16 }
 0x108   :  { %v88_v18 = vpop.f32.mrf.mxu1 }
 0x109   :  { %v89_v19 = vadd.f32 %v112_v17, %v88_v18 }
 0x10b   :  { %91 = vst.msk [vmem:[#allocation2] sm:$0xff] %vm30_vm0, %v89_v19 }
 0x10c   :  { %102 = dma.vmem_to_hbm [thread:$0]  %s98_s22, 128, %s100_s3, [#allocation3]  }
 0x10d   :  { %137 = dma.done.wait [#allocation3], 128  }
 0x10e   :  { %138 = vsyncadd [#allocation3], 4294967168 }
 0x10f   :  { %107 = vsyncpa [#allocation3], 1 }

</bundles_post_ra>
